<compile_context>
chip_gen: v7x
topology: tpu7x:2x2x1
jax: 0.10.0
libtpu: 0.0.40
codegen_flags: <defaults>
</compile_context>

<pallas_src>
import jax
import jax.numpy as jnp
from jax.experimental import pallas as pl
from jax.experimental.pallas import tpu as pltpu

# -----------------------------------------------------------------------------
# Problem sizes (small, consistent with the module)
# -----------------------------------------------------------------------------
BATCH      = 2
NUM_INPUTS = 4                       # number of variables selected over
INPUT_DIM  = 8                       # per-variable feature dim
HIDDEN_DIM = 32
FLAT_DIM   = NUM_INPUTS * INPUT_DIM  # GRN input dim (= 32)
LN_EPS     = 1e-5

# Lane folding: 4 batch rows share one 128-lane vreg (works because
# FLAT_DIM == HIDDEN_DIM == 32, so 4 * 32 == 128).
FOLD    = 4
FF      = FOLD * FLAT_DIM            # 128  folded input width
HF      = FOLD * HIDDEN_DIM          # 128  folded hidden width
NF      = FOLD * NUM_INPUTS          # 16   folded output width
FUSED_F = HF + NF                    # 144  folded [hidden | skip] width

MAX_B_TILE = 2048                    # original batch rows per grid step
MIN_B_TILE = FOLD * 8                # 32: fold * 8 sublanes


def _round_up(x, m):
    return ((x + m - 1) // m) * m


# -----------------------------------------------------------------------------
# Pallas kernel: fused GRN + softmax on one lane-folded (Bt/4, 128) batch tile.
# -----------------------------------------------------------------------------
def vsn_kernel(x_ref, w1_ref, w2_ref, g_ref, bias_ref, o_ref):
    x = x_ref[...]                                                  # (Bt4, 128) bf16

    # Fused block-diag [input_proj | skip_proj]: one bf16 MXU matmul, f32 acc.
    h0 = jnp.dot(x, w1_ref[...], preferred_element_type=jnp.float32)   # (Bt4, 144)
    h0 = h0 + bias_ref[0:1, :FUSED_F]
    h    = jnp.maximum(h0[:, :HF], 0.0)                             # relu(input_proj(x))
    skip = h0[:, HF:FUSED_F]                                        # skip_proj(x), (Bt4, 16)

    # hidden_layer (block-diag, bf16 MXU, f32 acc)
    h = jnp.dot(h.astype(jnp.bfloat16), w2_ref[0],
                preferred_element_type=jnp.float32) + bias_ref[1:2, :HF]

    # gate = sigmoid(Linear(h)); stable tanh form (EUP), no exp(-z) overflow.
    z = jnp.dot(h.astype(jnp.bfloat16), w2_ref[1],
                preferred_element_type=jnp.float32) + bias_ref[2:3, :HF]
    g = 0.5 * (jnp.tanh(0.5 * z) + 1.0)
    h = h * g                                                       # dropout == identity (eval)

    # output_proj (block-diag, zero-padded to 128 cols; keep first 16) + residual
    y = jnp.dot(h.astype(jnp.bfloat16), w2_ref[2],
                preferred_element_type=jnp.float32)[:, :NF]
    y = y + bias_ref[3:4, :NF] + skip                               # (Bt4, 16)

    # LayerNorm over each 4-lane group (biased variance, eps inside rsqrt).
    # Group reductions are done as tiny matmuls with the 4x4-block group-sum
    # matrix G, which broadcasts each group sum back onto its 4 lanes.
    G = g_ref[...]                                                  # (16, 16) f32
    mean = jnp.dot(y, G, preferred_element_type=jnp.float32) * (1.0 / NUM_INPUTS)
    c    = y - mean
    var  = jnp.dot(c * c, G, preferred_element_type=jnp.float32) * (1.0 / NUM_INPUTS)
    ln = c * jax.lax.rsqrt(var + LN_EPS)
    ln = ln * bias_ref[4:5, :NF] + bias_ref[5:6, :NF]

    # softmax over each 4-lane group.  Post-LN logits are bounded
    # (|ln| <= sqrt(N-1)*|gamma| + |beta|), so the max-shift is unnecessary.
    e = jnp.exp(ln)
    denom = jnp.dot(e, G, preferred_element_type=jnp.float32)
    o_ref[...] = (e * pl.reciprocal(denom, approx=True)).astype(o_ref.dtype)


# -----------------------------------------------------------------------------
# Parameter construction: PyTorch-style init + packing into lane-folded slabs.
# -----------------------------------------------------------------------------
def make_params(key):
    def linear(k, fan_in, fan_out):
        k1, k2 = jax.random.split(k)
        bound = 1.0 / jnp.sqrt(fan_in)
        w = jax.random.uniform(k1, (fan_in, fan_out), jnp.float32, -bound, bound)
        b = jax.random.uniform(k2, (fan_out,), jnp.float32, -bound, bound)
        return w, b

    ks = jax.random.split(key, 5)
    w_in,   b_in   = linear(ks[0], FLAT_DIM,   HIDDEN_DIM)   # input_proj
    w_hid,  b_hid  = linear(ks[1], HIDDEN_DIM, HIDDEN_DIM)   # hidden_layer
    w_gate, b_gate = linear(ks[2], HIDDEN_DIM, HIDDEN_DIM)   # gate linear
    w_out,  b_out  = linear(ks[3], HIDDEN_DIM, NUM_INPUTS)   # output_proj
    w_skip, b_skip = linear(ks[4], FLAT_DIM,   NUM_INPUTS)   # skip_proj
    gamma = jnp.ones((NUM_INPUTS,), jnp.float32)             # LayerNorm weight
    beta  = jnp.zeros((NUM_INPUTS,), jnp.float32)            # LayerNorm bias

    raw = dict(w_in=w_in, b_in=b_in, w_hid=w_hid, b_hid=b_hid,
               w_gate=w_gate, b_gate=b_gate, w_out=w_out, b_out=b_out,
               w_skip=w_skip, b_skip=b_skip, gamma=gamma, beta=beta)

    eye = jnp.eye(FOLD, dtype=jnp.float32)
    bd = lambda w: jnp.kron(eye, w)          # block-diagonal: 4 replicas of w
    tile4 = lambda v: jnp.tile(v, FOLD)      # 4x lane-tiled bias

    # Slab 1: fused block-diag [input_proj | skip_proj] weight, bf16.
    w1 = jnp.concatenate([bd(w_in), bd(w_skip)], axis=1).astype(jnp.bfloat16)  # (128, 144)

    # Slab 2: block-diag hidden / gate / output weights, bf16; w_out zero-padded.
    w_out_pad = jnp.zeros((HF, HF), jnp.float32).at[:, :NF].set(bd(w_out))
    w2 = jnp.stack([bd(w_hid), bd(w_gate), w_out_pad], axis=0).astype(jnp.bfloat16)  # (3,128,128)

    # Group-sum matrix: ones in 4x4 diagonal blocks.
    gmat = jnp.kron(eye, jnp.ones((NUM_INPUTS, NUM_INPUTS), jnp.float32))      # (16, 16)

    # Slab 3: all biases + LN affine, 4x lane-tiled, packed into one (8, 256) f32 slab.
    bias = jnp.zeros((8, 256), jnp.float32)
    bias = bias.at[0, :HF].set(tile4(b_in))
    bias = bias.at[0, HF:FUSED_F].set(tile4(b_skip))
    bias = bias.at[1, :HF].set(tile4(b_hid))
    bias = bias.at[2, :HF].set(tile4(b_gate))
    bias = bias.at[3, :NF].set(tile4(b_out))
    bias = bias.at[4, :NF].set(tile4(gamma))
    bias = bias.at[5, :NF].set(tile4(beta))

    return (w1, w2, gmat, bias), raw


# -----------------------------------------------------------------------------
# Wrapper
# -----------------------------------------------------------------------------
def variable_selection_network(x, params):
    """x: (B, num_inputs, input_dim) -> weights: (B, 1, num_inputs, 1)"""
    w1, w2, gmat, bias = params
    B = x.shape[0]

    flat = x.reshape(B, -1).astype(jnp.bfloat16)          # == torch view(B, -1), bf16 stream

    # Batch tile: aim for >= 2 grid steps (v7x has 2 TensorCores to shard the
    # "parallel" axis across), capped at MAX_B_TILE, multiple of 32 (= 4-row
    # lane fold * 8 sublanes).
    target = _round_up(pl.cdiv(max(B, 1), 2), MIN_B_TILE)
    b_tile = max(MIN_B_TILE, min(MAX_B_TILE, target))
    b_pad = _round_up(B, b_tile)
    if b_pad != B:
        flat = jnp.pad(flat, ((0, b_pad - B), (0, 0)))

    folded = flat.reshape(b_pad // FOLD, FF)              # free contiguous view: 4 rows -> 128 lanes
    bt4 = b_tile // FOLD
    grid = (b_pad // b_tile,)

    out = pl.pallas_call(
        vsn_kernel,
        out_shape=jax.ShapeDtypeStruct((b_pad // FOLD, NF), jnp.float32),
        grid=grid,
        in_specs=[
            # lane-folded batch tile advances with the grid index
            pl.BlockSpec((bt4, FF), lambda i: (i, 0)),
            # parameter slabs: constant index maps -> DMA'd once, VMEM-resident
            pl.BlockSpec((FF, FUSED_F), lambda i: (0, 0)),
            pl.BlockSpec((3, HF, HF), lambda i: (0, 0, 0)),
            pl.BlockSpec((NF, NF), lambda i: (0, 0)),
            pl.BlockSpec((8, 256), lambda i: (0, 0)),
        ],
        out_specs=pl.BlockSpec((bt4, NF), lambda i: (i, 0)),
        compiler_params=pltpu.CompilerParams(
            dimension_semantics=("parallel",)),
    )(folded, w1, w2, gmat, bias)

    # Un-fold: (B/4, 16) -> (B, 4); drop padded rows.
    return out.reshape(b_pad, NUM_INPUTS)[:B].reshape(B, 1, NUM_INPUTS, 1)


# -----------------------------------------------------------------------------
# Pure-JAX reference: the module's math in f32 (PyTorch eval semantics), from
# the original un-fused parameters.  The kernel runs its matmuls with bf16
# weights/activations, so the comparison tolerance reflects bf16 inference
# precision (~1e-2 on the softmax weights at worst).
# -----------------------------------------------------------------------------
def reference(x, p):
    B = x.shape[0]
    xf = x.reshape(B, -1).astype(jnp.bfloat16).astype(jnp.float32)
    hi = "highest"

    skip = jnp.dot(xf, p["w_skip"], precision=hi) + p["b_skip"]
    h = jnp.maximum(jnp.dot(xf, p["w_in"], precision=hi) + p["b_in"], 0.0)
    h = jnp.dot(h, p["w_hid"], precision=hi) + p["b_hid"]
    g = jax.nn.sigmoid(jnp.dot(h, p["w_gate"], precision=hi) + p["b_gate"])
    h = h * g                                             # dropout == identity (eval)
    y = jnp.dot(h, p["w_out"], precision=hi) + p["b_out"] + skip

    mean = jnp.mean(y, -1, keepdims=True)
    var = jnp.mean((y - mean) ** 2, -1, keepdims=True)
    ln = (y - mean) / jnp.sqrt(var + LN_EPS) * p["gamma"] + p["beta"]
    w = jax.nn.softmax(ln, axis=-1)
    return w.reshape(B, 1, NUM_INPUTS, 1)


if __name__ == "__main__":
    key = jax.random.PRNGKey(0)
    kx, kp = jax.random.split(key)
    x = jax.random.normal(kx, (BATCH, NUM_INPUTS, INPUT_DIM), jnp.float32)
    kernel_params, raw_params = make_params(kp)

    out = variable_selection_network(x, kernel_params)
    out = jax.block_until_ready(out)

    ref = reference(x, raw_params)
    assert out.shape == (BATCH, 1, NUM_INPUTS, 1)
    # bf16-weight inference precision: allow ~1e-2 on softmax selection weights.
    assert jnp.allclose(out, ref, atol=2e-2, rtol=0.0), float(jnp.max(jnp.abs(out - ref)))

    print("KERNEL_OK")
</pallas_src>

<mosaic_0001>
module attributes {stable_mosaic.version = 11 : i64} {
  func.func @vsn_kernel(%arg0: i32, %arg1: memref<8x128xbf16, #tpu.memory_space<vmem>>, %arg2: memref<128x144xbf16, #tpu.memory_space<vmem>>, %arg3: memref<3x128x128xbf16, #tpu.memory_space<vmem>>, %arg4: memref<16x16xf32, #tpu.memory_space<vmem>>, %arg5: memref<8x256xf32, #tpu.memory_space<vmem>>, %arg6: memref<8x16xf32, #tpu.memory_space<vmem>>) attributes {dimension_semantics = [#tpu.dimension_semantics<parallel>], iteration_bounds = array<i64: 1>, scalar_prefetch = 0 : i64, scratch_operands = 0 : i64, tpu.core_type = #tpu.core_type<tc>, window_params = [{transform_indices = @transform_0, window_bounds = array<i64: 8, 128>}, {pipeline_mode = #tpu.pipeline_mode<synchronous>, transform_indices = @transform_1, window_bounds = array<i64: 128, 144>}, {pipeline_mode = #tpu.pipeline_mode<synchronous>, transform_indices = @transform_2, window_bounds = array<i64: 3, 128, 128>}, {pipeline_mode = #tpu.pipeline_mode<synchronous>, transform_indices = @transform_3, window_bounds = array<i64: 16, 16>}, {pipeline_mode = #tpu.pipeline_mode<synchronous>, transform_indices = @transform_4, window_bounds = array<i64: 8, 256>}, {transform_indices = @transform_5, window_bounds = array<i64: 8, 16>}]} {
    %c0 = arith.constant 0 : index
    %c0_0 = arith.constant 0 : index
    %0 = vector.load %arg1[%c0, %c0_0] : memref<8x128xbf16, #tpu.memory_space<vmem>>, vector<8x128xbf16>
    %c0_1 = arith.constant 0 : index
    %c0_2 = arith.constant 0 : index
    %1 = vector.load %arg2[%c0_1, %c0_2] : memref<128x144xbf16, #tpu.memory_space<vmem>>, vector<128x144xbf16>
    %cst = arith.constant dense<0.000000e+00> : vector<8x144xf32>
    %2 = tpu.matmul %0, %1, %cst {dimension_numbers = #tpu.dot_dimension_numbers<[1], [0], [0], [1], [0, 0, 1, 1], [], []>} : vector<8x128xbf16>, vector<128x144xbf16>, vector<8x144xf32> -> vector<8x144xf32>
    %c0_3 = arith.constant 0 : index
    %c0_4 = arith.constant 0 : index
    %3 = vector.load %arg5[%c0_3, %c0_4] : memref<8x256xf32, #tpu.memory_space<vmem>>, vector<1x144xf32>
    %4 = vector.broadcast %3 : vector<1x144xf32> to vector<8x144xf32>
    %5 = arith.addf %2, %4 : vector<8x144xf32>
    %6 = vector.extract_strided_slice %5 {offsets = [0, 0], sizes = [8, 128], strides = [1, 1]} : vector<8x144xf32> to vector<8x128xf32>
    %cst_5 = arith.constant 0.000000e+00 : f32
    %7 = vector.broadcast %cst_5 : f32 to vector<8x128xf32>
    %8 = arith.maximumf %6, %7 : vector<8x128xf32>
    %9 = vector.extract_strided_slice %5 {offsets = [0, 128], sizes = [8, 16], strides = [1, 1]} : vector<8x144xf32> to vector<8x16xf32>
    %10 = arith.truncf %8 : vector<8x128xf32> to vector<8x128xbf16>
    %c0_6 = arith.constant 0 : index
    %c0_7 = arith.constant 0 : index
    %c0_8 = arith.constant 0 : index
    %11 = vector.load %arg3[%c0_6, %c0_7, %c0_8] : memref<3x128x128xbf16, #tpu.memory_space<vmem>>, vector<1x128x128xbf16>
    %12 = vector.shape_cast %11 : vector<1x128x128xbf16> to vector<128x128xbf16>
    %cst_9 = arith.constant dense<0.000000e+00> : vector<8x128xf32>
    %13 = tpu.matmul %10, %12, %cst_9 {dimension_numbers = #tpu.dot_dimension_numbers<[1], [0], [0], [1], [0, 0, 1, 1], [], []>} : vector<8x128xbf16>, vector<128x128xbf16>, vector<8x128xf32> -> vector<8x128xf32>
    %c1 = arith.constant 1 : index
    %c0_10 = arith.constant 0 : index
    %14 = vector.load %arg5[%c1, %c0_10] : memref<8x256xf32, #tpu.memory_space<vmem>>, vector<1x128xf32>
    %15 = vector.broadcast %14 : vector<1x128xf32> to vector<8x128xf32>
    %16 = arith.addf %13, %15 : vector<8x128xf32>
    %17 = arith.truncf %16 : vector<8x128xf32> to vector<8x128xbf16>
    %c1_11 = arith.constant 1 : index
    %c0_12 = arith.constant 0 : index
    %c0_13 = arith.constant 0 : index
    %18 = vector.load %arg3[%c1_11, %c0_12, %c0_13] : memref<3x128x128xbf16, #tpu.memory_space<vmem>>, vector<1x128x128xbf16>
    %19 = vector.shape_cast %18 : vector<1x128x128xbf16> to vector<128x128xbf16>
    %cst_14 = arith.constant dense<0.000000e+00> : vector<8x128xf32>
    %20 = tpu.matmul %17, %19, %cst_14 {dimension_numbers = #tpu.dot_dimension_numbers<[1], [0], [0], [1], [0, 0, 1, 1], [], []>} : vector<8x128xbf16>, vector<128x128xbf16>, vector<8x128xf32> -> vector<8x128xf32>
    %c2 = arith.constant 2 : index
    %c0_15 = arith.constant 0 : index
    %21 = vector.load %arg5[%c2, %c0_15] : memref<8x256xf32, #tpu.memory_space<vmem>>, vector<1x128xf32>
    %22 = vector.broadcast %21 : vector<1x128xf32> to vector<8x128xf32>
    %23 = arith.addf %20, %22 : vector<8x128xf32>
    %cst_16 = arith.constant 5.000000e-01 : f32
    %24 = vector.broadcast %cst_16 : f32 to vector<8x128xf32>
    %25 = arith.mulf %24, %23 : vector<8x128xf32>
    %26 = math.tanh %25 : vector<8x128xf32>
    %cst_17 = arith.constant 1.000000e+00 : f32
    %27 = vector.broadcast %cst_17 : f32 to vector<8x128xf32>
    %28 = arith.addf %26, %27 : vector<8x128xf32>
    %cst_18 = arith.constant 5.000000e-01 : f32
    %29 = vector.broadcast %cst_18 : f32 to vector<8x128xf32>
    %30 = arith.mulf %29, %28 : vector<8x128xf32>
    %31 = arith.mulf %16, %30 : vector<8x128xf32>
    %32 = arith.truncf %31 : vector<8x128xf32> to vector<8x128xbf16>
    %c2_19 = arith.constant 2 : index
    %c0_20 = arith.constant 0 : index
    %c0_21 = arith.constant 0 : index
    %33 = vector.load %arg3[%c2_19, %c0_20, %c0_21] : memref<3x128x128xbf16, #tpu.memory_space<vmem>>, vector<1x128x128xbf16>
    %34 = vector.shape_cast %33 : vector<1x128x128xbf16> to vector<128x128xbf16>
    %cst_22 = arith.constant dense<0.000000e+00> : vector<8x128xf32>
    %35 = tpu.matmul %32, %34, %cst_22 {dimension_numbers = #tpu.dot_dimension_numbers<[1], [0], [0], [1], [0, 0, 1, 1], [], []>} : vector<8x128xbf16>, vector<128x128xbf16>, vector<8x128xf32> -> vector<8x128xf32>
    %36 = vector.extract_strided_slice %35 {offsets = [0, 0], sizes = [8, 16], strides = [1, 1]} : vector<8x128xf32> to vector<8x16xf32>
    %c3 = arith.constant 3 : index
    %c0_23 = arith.constant 0 : index
    %37 = vector.load %arg5[%c3, %c0_23] : memref<8x256xf32, #tpu.memory_space<vmem>>, vector<1x16xf32>
    %38 = vector.broadcast %37 : vector<1x16xf32> to vector<8x16xf32>
    %39 = arith.addf %36, %38 : vector<8x16xf32>
    %40 = arith.addf %39, %9 : vector<8x16xf32>
    %c0_24 = arith.constant 0 : index
    %c0_25 = arith.constant 0 : index
    %41 = vector.load %arg4[%c0_24, %c0_25] : memref<16x16xf32, #tpu.memory_space<vmem>>, vector<16x16xf32>
    %cst_26 = arith.constant dense<0.000000e+00> : vector<8x16xf32>
    %42 = tpu.matmul %40, %41, %cst_26 {dimension_numbers = #tpu.dot_dimension_numbers<[1], [0], [0], [1], [0, 0, 1, 1], [], []>} : vector<8x16xf32>, vector<16x16xf32>, vector<8x16xf32> -> vector<8x16xf32>
    %cst_27 = arith.constant 2.500000e-01 : f32
    %43 = vector.broadcast %cst_27 : f32 to vector<8x16xf32>
    %44 = arith.mulf %42, %43 : vector<8x16xf32>
    %45 = arith.subf %40, %44 : vector<8x16xf32>
    %46 = arith.mulf %45, %45 : vector<8x16xf32>
    %cst_28 = arith.constant dense<0.000000e+00> : vector<8x16xf32>
    %47 = tpu.matmul %46, %41, %cst_28 {dimension_numbers = #tpu.dot_dimension_numbers<[1], [0], [0], [1], [0, 0, 1, 1], [], []>} : vector<8x16xf32>, vector<16x16xf32>, vector<8x16xf32> -> vector<8x16xf32>
    %cst_29 = arith.constant 2.500000e-01 : f32
    %48 = vector.broadcast %cst_29 : f32 to vector<8x16xf32>
    %49 = arith.mulf %47, %48 : vector<8x16xf32>
    %cst_30 = arith.constant 9.99999974E-6 : f32
    %50 = vector.broadcast %cst_30 : f32 to vector<8x16xf32>
    %51 = arith.addf %49, %50 : vector<8x16xf32>
    %52 = math.rsqrt %51 : vector<8x16xf32>
    %53 = arith.mulf %45, %52 : vector<8x16xf32>
    %c4 = arith.constant 4 : index
    %c0_31 = arith.constant 0 : index
    %54 = vector.load %arg5[%c4, %c0_31] : memref<8x256xf32, #tpu.memory_space<vmem>>, vector<1x16xf32>
    %55 = vector.broadcast %54 : vector<1x16xf32> to vector<8x16xf32>
    %56 = arith.mulf %53, %55 : vector<8x16xf32>
    %c5 = arith.constant 5 : index
    %c0_32 = arith.constant 0 : index
    %57 = vector.load %arg5[%c5, %c0_32] : memref<8x256xf32, #tpu.memory_space<vmem>>, vector<1x16xf32>
    %58 = vector.broadcast %57 : vector<1x16xf32> to vector<8x16xf32>
    %59 = arith.addf %56, %58 : vector<8x16xf32>
    %60 = math.exp %59 : vector<8x16xf32>
    %cst_33 = arith.constant dense<0.000000e+00> : vector<8x16xf32>
    %61 = tpu.matmul %60, %41, %cst_33 {dimension_numbers = #tpu.dot_dimension_numbers<[1], [0], [0], [1], [0, 0, 1, 1], [], []>} : vector<8x16xf32>, vector<16x16xf32>, vector<8x16xf32> -> vector<8x16xf32>
    %62 = tpu.reciprocal %61 {approx = true} : vector<8x16xf32> -> vector<8x16xf32>
    %63 = arith.mulf %60, %62 : vector<8x16xf32>
    %c0_34 = arith.constant 0 : index
    %c0_35 = arith.constant 0 : index
    %64 = vector.load %arg6[%c0_34, %c0_35] : memref<8x16xf32, #tpu.memory_space<vmem>>, vector<8x16xf32>
    tpu.vector_store %arg6[%c0_34, %c0_35], %63 {strides = array<i32>} : memref<8x16xf32, #tpu.memory_space<vmem>>, vector<8x16xf32>,
    return
  }
  func.func @transform_0(%arg0: i32) -> (i32, i32) {
    %c0_i32 = arith.constant 0 : i32
    %c0_i32_0 = arith.constant 0 : i32
    return %arg0, %c0_i32 : i32, i32
  }
  func.func @transform_1(%arg0: i32) -> (i32, i32) {
    %c0_i32 = arith.constant 0 : i32
    %c0_i32_0 = arith.constant 0 : i32
    %c0_i32_1 = arith.constant 0 : i32
    return %c0_i32, %c0_i32_0 : i32, i32
  }
  func.func @transform_2(%arg0: i32) -> (i32, i32, i32) {
    %c0_i32 = arith.constant 0 : i32
    %c0_i32_0 = arith.constant 0 : i32
    %c0_i32_1 = arith.constant 0 : i32
    %c0_i32_2 = arith.constant 0 : i32
    return %c0_i32, %c0_i32_0, %c0_i32_1 : i32, i32, i32
  }
  func.func @transform_3(%arg0: i32) -> (i32, i32) {
    %c0_i32 = arith.constant 0 : i32
    %c0_i32_0 = arith.constant 0 : i32
    %c0_i32_1 = arith.constant 0 : i32
    return %c0_i32, %c0_i32_0 : i32, i32
  }
  func.func @transform_4(%arg0: i32) -> (i32, i32) {
    %c0_i32 = arith.constant 0 : i32
    %c0_i32_0 = arith.constant 0 : i32
    %c0_i32_1 = arith.constant 0 : i32
    return %c0_i32, %c0_i32_0 : i32, i32
  }
  func.func @transform_5(%arg0: i32) -> (i32, i32) {
    %c0_i32 = arith.constant 0 : i32
    %c0_i32_0 = arith.constant 0 : i32
    return %arg0, %c0_i32 : i32, i32
  }
}

</mosaic_0001>

<bundles_post_ra>
// kernel: tpu_custom_call.1
= control target key start
LH: loop header
LB: loop body
LE: loop exit
PB: predicated region body
PF: predicated region fallthrough
CT: control target
= control target key end

     0   :  { %10 = vsyncpa [#allocation3], 0  ;;  %s1364_s0 = inlined_call_operand.hbm [shape: bf16[8,128], index: 0, kind: input, shape index: {}]   ;;  %s1365_s1 = inlined_call_operand.vmem [shape: bf16[128,144], index: 1, kind: input, shape index: {}]   ;;  %s1366_s2 = inlined_call_operand.vmem [shape: bf16[3,128,128], index: 2, kind: input, shape index: {}]   ;;  %s1367_s3 = inlined_call_operand.vmem [shape: f32[16,16], index: 3, kind: input, shape index: {}]   ;;  %s1368_s4 = inlined_call_operand.hbm [shape: f32[8,256], index: 4, kind: input, shape index: {}]   ;;  %s1369_s5 = inlined_call_operand.hbm [shape: f32[8,16], index: 5, kind: output, shape index: {}]  }
   0x1   :  { %11 = vsyncpa [#allocation6], 0 }
   0x2   :  { %12 = vsyncpa [#allocation4], 0  ;;  %s1114_s18 = smov [#allocation2]   ;;  %s1115_s20 = smov [#allocation5]  }
   0x3   :  { %s19_s19 = sshll.u32 %s1114_s18, 4  ;;  %s35_s21 = sshll.u32 %s1115_s20, 4  ;;  %s20_s19 = int_to_ptr.vmem [resolvable:$true] %s19_s19  ;;  %s36_s21 = int_to_ptr.vmem [resolvable:$true] %s35_s21 }
   0x4   :  { %s1042_s24 = scalar_lea.hbm %s1364_s0, 64 }
   0x5   :  { %p1043_p0 = scmp.ne.s32.totalorder %s1364_s0, %s1042_s24  ;;  %p1046_p1 = scmp.lt.u32.totalorder %s1042_s24, %s1364_s0 }
   0x7   :  { %p1048_p2 = pnand %p1046_p1, %p1043_p0 }
   0x9   :  { %1051 = shalt.err (!%p1048_p2)
}
   0xa   :  { %s1052_s29 = scalar_lea.vmem %s20_s19, 64  ;;  %p1057_p4 = scmp.lt.s32.totalorder %s20_s19, %s20_s19 }
   0xb   :  { %p1053_p3 = scmp.ne.s32.totalorder %s20_s19, %s1052_s29  ;;  %p1058_p5 = scmp.lt.s32.totalorder %s1052_s29, %s1052_s29 }
   0xd   :  { %p1059_p6 = por %p1058_p5, %p1057_p4 }
   0xf   :  { %p1060_p7 = pnand %p1059_p6, %p1053_p3 }
  0x11   :  { %1063 = shalt.err (!%p1060_p7)
}
  0x12   :  { %22 = dma.hbm_to_vmem [thread:$0]  %s1364_s0, 64, %s20_s19, [#allocation3]  }
  0x13   :  { %s1064_s9 = scalar_lea.hbm %s1368_s4, 256 }
  0x14   :  { %p1065_p8 = scmp.ne.s32.totalorder %s1368_s4, %s1064_s9  ;;  %p1068_p9 = scmp.lt.u32.totalorder %s1064_s9, %s1368_s4 }
  0x16   :  { %p1070_p10 = pnand %p1068_p9, %p1065_p8 }
  0x18   :  { %1073 = shalt.err (!%p1070_p10)
}
  0x19   :  { %s1074_s14 = scalar_lea.vmem %s36_s21, 256  ;;  %p1079_p12 = scmp.lt.s32.totalorder %s36_s21, %s36_s21 }
  0x1a   :  { %p1075_p11 = scmp.ne.s32.totalorder %s36_s21, %s1074_s14  ;;  %p1080_p13 = scmp.lt.s32.totalorder %s1074_s14, %s1074_s14 }
  0x1c   :  { %p1081_p0 = por %p1080_p13, %p1079_p12 }
  0x1e   :  { %p1082_p1 = pnand %p1081_p0, %p1075_p11 }
  0x20   :  { %1085 = shalt.err (!%p1082_p1)
}
  0x21   :  { %38 = dma.hbm_to_vmem [thread:$0]  %s1368_s4, 256, %s36_s21, [#allocation6]  }
  0x22   :  { %1108 = dma.done.wait [#allocation3], 64  }
  0x23   :  { %1109 = vsyncadd [#allocation3], 4294967232 }
  0x24   :  { %1110 = dma.done.wait [#allocation6], 256  }
  0x25   :  { %1111 = vsyncadd [#allocation6], 4294967040  ;;  %v1116_v0 = vmov 0   ;;  %v1117_v1 = vmov 0.0   ;;  %v986_v2 = vld [vmem:[%s1365_s1 + $0x4] ss:$8 sps:$4 sm:$0xff]   ;;  %v65_v34 = vlaneseq }
  0x26   :  { %187 = vmatprep.mubr.bf16.mxu0 %v1116_v0  ;;  %889 = vmatprep.subr.bf16.mxu1 %v1117_v1  ;;  %v988_v3 = vld [vmem:[%s1365_s1] ss:$8 sps:$4 sm:$0xff]   ;;  %v989_v4 = vld [vmem:[%s1365_s1 + $0x14] ss:$8 sps:$4 sm:$0xff]   ;;  %v991_v5 = vld [vmem:[%s1365_s1 + $0x10] ss:$8 sps:$4 sm:$0xff]  }
  0x27   :  { %155 = vmatprep.subr.bf16.mxu0 %v986_v2  ;;  %v992_v6 = vld [vmem:[%s1365_s1 + $0x24] ss:$8 sps:$4 sm:$0xff]   ;;  %v994_v7 = vld [vmem:[%s1365_s1 + $0x20] ss:$8 sps:$4 sm:$0xff]   ;;  %v995_v8 = vld [vmem:[%s1365_s1 + $0x34] ss:$8 sps:$4 sm:$0xff]  }
  0x28   :  { %156 = vmatpush1.bf16.msra.mxu0 %v988_v3  ;;  %v997_v9 = vld [vmem:[%s1365_s1 + $0x30] ss:$8 sps:$4 sm:$0xff]   ;;  %v1010_v10 = vld [vmem:[%s1366_s2] sm:$0xff]   ;;  %v1011_v12 = vld [vmem:[%s1366_s2 + $0x8] sm:$0xff]   ;;  %vm1118_vm0 = vmmov 0   ;;  %v1289_v35 = vshrl.u32 %v65_v34, 7 }
  0x29   :  { %157 = vmatprep.subr.bf16.mxu0 %v989_v4  ;;  %v998_v11 = vld [vmem:[%s1365_s1 + $0x44] ss:$8 sps:$4 sm:$0xff]   ;;  %890 = vmatpush3.bf16.msra.mxu1 %v1010_v10  ;;  %v1000_v13 = vld [vmem:[%s1365_s1 + $0x40] ss:$8 sps:$4 sm:$0xff]   ;;  %v1001_v14 = vld [vmem:[%s1365_s1 + $0x54] ss:$8 sps:$4 sm:$0xff]  }
  0x2a   :  { %891 = vmatprep.subr.bf16.mxu1 %v1117_v1  ;;  %v1003_v15 = vld [vmem:[%s1365_s1 + $0x50] ss:$8 sps:$4 sm:$0xff]   ;;  %v1004_v17 = vld [vmem:[%s1365_s1 + $0x64] ss:$8 sps:$4 sm:$0xff]   ;;  %v1006_v19 = vld [vmem:[%s1365_s1 + $0x60] ss:$8 sps:$4 sm:$0xff]   ;;  %905 = vmatprep.mubr.msk.bf16.mxu1 %vm1118_vm0, %v1117_v1 }
  0x2b   :  { %v1012_v16 = vld [vmem:[%s1366_s2 + $0x10] sm:$0xff]   ;;  %v1013_v18 = vld [vmem:[%s1366_s2 + $0x18] sm:$0xff]   ;;  %v1014_v21 = vld [vmem:[%s1366_s2 + $0x20] sm:$0xff]   ;;  %v67_v36 = vsub.s32 0, %v1289_v35  ;;  %v1119_v0 = vmov 0.0|0.0   ;;  %vm526_vm1 = vcmask 130048  }
  0x2c   :  { %158 = vmatpush1.bf16.msra.mxu0 %v991_v5  ;;  %v1007_v20 = vld [vmem:[%s1365_s1 + $0x74] ss:$8 sps:$4 sm:$0xff]   ;;  %v1009_v22 = vld [vmem:[%s1365_s1 + $0x70] ss:$8 sps:$4 sm:$0xff]   ;;  %v1015_v23 = vld [vmem:[%s1366_s2 + $0x28] sm:$0xff]  }
  0x2d   :  { %159 = vmatprep.subr.bf16.mxu0 %v992_v6  ;;  %892 = vmatpush3.bf16.msra.mxu1 %v1011_v12  ;;  %v46_v24 = vld [vmem:[#allocation2] sm:$0xf]  ;;  %v1016_v25 = vld [vmem:[%s1366_s2 + $0x30] sm:$0xff]   ;;  %v1017_v26 = vld [vmem:[%s1366_s2 + $0x38] sm:$0xff]  }
  0x2e   :  { %893 = vmatprep.subr.bf16.mxu1 %v1117_v1  ;;  %v1018_v27 = vld [vmem:[%s1366_s2 + $0x40] sm:$0xff]   ;;  %v1019_v28 = vld [vmem:[%s1366_s2 + $0x48] sm:$0xff]   ;;  %v1020_v29 = vld [vmem:[%s1366_s2 + $0x50] sm:$0xff]  }
  0x2f   :  { %v1021_v30 = vld [vmem:[%s1366_s2 + $0x58] sm:$0xff]   ;;  %v1022_v31 = vld [vmem:[%s1366_s2 + $0x60] sm:$0xff]   ;;  %v1023_v32 = vld [vmem:[%s1366_s2 + $0x68] sm:$0xff]  }
  0x30   :  { %160 = vmatpush1.bf16.msra.mxu0 %v994_v7  ;;  %v1024_v33 = vld [vmem:[%s1366_s2 + $0x70] sm:$0xff]   ;;  %v1292_v37 = vld [vmem:[#allocation5] ss:$8 sm:$0x3]  ;;  %v1025_v46 = vld [vmem:[%s1366_s2 + $0x78] sm:$0xff]  }
  0x31   :  { %161 = vmatprep.subr.bf16.mxu0 %v995_v8  ;;  %894 = vmatpush3.bf16.msra.mxu1 %v1012_v16  ;;  %v68_v38 = vrot.slane %v1292_v37, %v67_v36  ;;  %v1026_v47 = vld [vmem:[%s1366_s2 + $0x80] sm:$0xff]   ;;  %v1027_v48 = vld [vmem:[%s1366_s2 + $0x88] sm:$0xff]   ;;  %v1028_v56 = vld [vmem:[%s1366_s2 + $0x90] sm:$0xff]  }
  0x32   :  { %895 = vmatprep.subr.bf16.mxu1 %v1117_v1  ;;  %v214_v49 = vld [vmem:[#allocation5 + $0x1] ss:$0 sm:$0xff]  ;;  %v1029_v57 = vld [vmem:[%s1366_s2 + $0x98] sm:$0xff]   ;;  %v1031_v59 = vld [vmem:[%s1366_s2 + $0xa8] sm:$0xff]  }
  0x33   :  { %v1030_v58 = vld [vmem:[%s1366_s2 + $0xa0] sm:$0xff]   ;;  %v1032_v60 = vld [vmem:[%s1366_s2 + $0xb0] sm:$0xff]   ;;  %v1033_v61 = vld [vmem:[%s1366_s2 + $0xb8] sm:$0xff]   ;;  %s1120_s2 = smov [#allocation7]  }
  0x34   :  { %162 = vmatpush1.bf16.msra.mxu0 %v997_v9  ;;  %v524_v62 = vld [vmem:[%s1367_s3] sm:$0xff]  ;;  %v525_v63 = vld [vmem:[%s1367_s3 + $0x8] sm:$0xff]  ;;  %s768_s3 = sshll.u32 %s1120_s2, 4  ;;  %s769_s3 = int_to_ptr.vmem [resolvable:$true] %s768_s3 }
  0x35   :  { %163 = vmatprep.subr.bf16.mxu0 %v998_v11  ;;  %896 = vmatpush3.bf16.msra.mxu1 %v1013_v18  ;;  %v971_v2 = vpack.c.bf16 %v525_v63, %v524_v62  ;;  %v321_v3 = vld [vmem:[#allocation5 + $0x2] ss:$0 sm:$0xff]  ;;  %s1086_s17 = scalar_lea.vmem %s769_s3, 128  ;;  %p1091_p3 = scmp.lt.s32.totalorder %s769_s3, %s769_s3 }
  0x36   :  { %897 = vmatprep.subr.bf16.mxu1 %v1117_v1  ;;  %p1087_p2 = scmp.ne.s32.totalorder %s769_s3, %s1086_s17  ;;  %p1092_p4 = scmp.lt.s32.totalorder %s1086_s17, %s1086_s17 }
  0x38   :  { %164 = vmatpush1.bf16.msra.mxu0 %v1000_v13  ;;  %p1093_p5 = por %p1092_p4, %p1091_p3 }
  0x39   :  { %165 = vmatprep.subr.bf16.mxu0 %v1001_v14  ;;  %898 = vmatpush3.bf16.msra.mxu1 %v1014_v21 }
  0x3a   :  { %899 = vmatprep.subr.bf16.mxu1 %v1117_v1  ;;  %p1094_p6 = pnand %p1093_p5, %p1087_p2 }
  0x3c   :  { %166 = vmatpush1.bf16.msra.mxu0 %v1003_v15  ;;  %v71_v15 = vsub.s32 1, %v1289_v35  ;;  %v680_v35 = vld [vmem:[#allocation5 + $0x4] ss:$0 sm:$0xff] }
  0x3d   :  { %167 = vmatprep.subr.bf16.mxu0 %v1004_v17  ;;  %900 = vmatpush3.bf16.msra.mxu1 %v1015_v23  ;;  %v521_v17 = vld [vmem:[#allocation5 + $0x3] ss:$0 sm:$0xff] }
  0x3e   :  { %901 = vmatprep.subr.bf16.mxu1 %v1117_v1  ;;  %v72_v16 = vrot.slane %v1292_v37, %v71_v15  ;;  %v682_v37 = vld [vmem:[#allocation5 + $0x5] ss:$0 sm:$0xff] }
  0x40   :  { %168 = vmatpush1.bf16.msra.mxu0 %v1006_v19 }
  0x41   :  { %169 = vmatprep.subr.bf16.mxu0 %v1007_v20  ;;  %902 = vmatpush3.bf16.msra.mxu1 %v1016_v25 }
  0x42   :  { %903 = vmatprep.subr.bf16.mxu1 %v1117_v1 }
  0x44   :  { %170 = vmatpush1.bf16.msra.mxu0 %v1009_v22 }
  0x45   :  { %909 = vmatprep.subr.bf16.mxu0 %v1117_v1  ;;  %904 = vmatpush3.bf16.msra.mxu1 %v1017_v26 }
  0x46   :  { %929 = vmatprep.subr.bf16.mxu1 %v1117_v1 }
  0x47   :  { %188 = vmatmul.mubr.bf16.vlgmr.msra.gmra.mrb[0].mxu0 %v46_v24 }
  0x48   :  { %925 = vmatprep.mubr.msk.bf16.mxu0 %vm1118_vm0, %v1117_v1  ;;  %910 = vmatpush3.bf16.msra.mxu0 %v1018_v27 }
  0x49   :  { %911 = vmatprep.subr.bf16.mxu0 %v1117_v1 }
  0x4c   :  { %912 = vmatpush3.bf16.msra.mxu0 %v1019_v28 }
  0x4d   :  { %913 = vmatprep.subr.bf16.mxu0 %v1117_v1 }
  0x50   :  { %914 = vmatpush3.bf16.msra.mxu0 %v1020_v29 }
  0x51   :  { %915 = vmatprep.subr.bf16.mxu0 %v1117_v1 }
  0x54   :  { %916 = vmatpush3.bf16.msra.mxu0 %v1021_v30 }
  0x55   :  { %917 = vmatprep.subr.bf16.mxu0 %v1117_v1 }
  0x58   :  { %918 = vmatpush3.bf16.msra.mxu0 %v1022_v31 }
  0x59   :  { %919 = vmatprep.subr.bf16.mxu0 %v1117_v1 }
  0x5c   :  { %920 = vmatpush3.bf16.msra.mxu0 %v1023_v32 }
  0x5d   :  { %921 = vmatprep.subr.bf16.mxu0 %v1117_v1 }
  0x60   :  { %922 = vmatpush3.bf16.msra.mxu0 %v1024_v33 }
  0x61   :  { %923 = vmatprep.subr.bf16.mxu0 %v1117_v1 }
  0x64   :  { %924 = vmatpush3.bf16.msra.mxu0 %v1025_v46 }
  0x65   :  { %970 = vmatprep.subr.bf16.mxu0 %v1119_v0 }
 0x11a   :  { %v189_v39 = vpop.f32.mrb[0].mxu0 }
 0x11b   :  { %v190_v40 = vadd.f32 %v189_v39, %v68_v38  ;;  %v1295_v41 = vpop.f32.mrb[1].mxu0 }
 0x11c   :  { %v193_v42 = vpop.f32.mrb[2].mxu0  ;;  %v192_v19 = vadd.f32 %v1295_v41, %v72_v16 }
 0x11d   :  { %v196_v43 = vmax.f32 %v190_v40, 0.0  ;;  %v194_v44 = vpop.f32.mrb[3].mxu0 }
 0x11f   :  { %v197_v45 = vpack.c.bf16 %v196_v43, %v196_v43 }
 0x121   :  { %906 = vmatmul.mubr.bf16.vlgmr.msra.gmra.mrb[0].mxu1 %v197_v45 }
 0x122   :  { %945 = vmatprep.mubr.msk.bf16.mxu1 %vm1118_vm0, %v1117_v1  ;;  %930 = vmatpush3.bf16.msra.mxu1 %v1026_v47 }
 0x123   :  { %931 = vmatprep.subr.bf16.mxu1 %v1117_v1 }
 0x126   :  { %932 = vmatpush3.bf16.msra.mxu1 %v1027_v48 }
 0x127   :  { %933 = vmatprep.subr.bf16.mxu1 %v1117_v1 }
 0x12a   :  { %934 = vmatpush3.bf16.msra.mxu1 %v1028_v56 }
 0x12b   :  { %935 = vmatprep.subr.bf16.mxu1 %v1117_v1 }
 0x12e   :  { %936 = vmatpush3.bf16.msra.mxu1 %v1029_v57 }
 0x12f   :  { %937 = vmatprep.subr.bf16.mxu1 %v1117_v1 }
 0x132   :  { %938 = vmatpush3.bf16.msra.mxu1 %v1030_v58 }
 0x133   :  { %939 = vmatprep.subr.bf16.mxu1 %v1117_v1 }
 0x136   :  { %940 = vmatpush3.bf16.msra.mxu1 %v1031_v59 }
 0x137   :  { %941 = vmatprep.subr.bf16.mxu1 %v1117_v1 }
 0x13a   :  { %942 = vmatpush3.bf16.msra.mxu1 %v1032_v60 }
 0x13b   :  { %943 = vmatprep.subr.bf16.mxu1 %v1117_v1 }
 0x13e   :  { %944 = vmatpush3.bf16.msra.mxu1 %v1033_v61 }
 0x13f   :  { %973 = vmatprep.subr.bf16.mxu1 %v1119_v0 }
 0x1f4   :  { %v297_v50 = vpop.f32.mrb[0].mxu1 }
 0x1f5   :  { %v298_v51 = vadd.f32 %v297_v50, %v214_v49  ;;  %v907_v52 = vpop.f32.mrb[1].mxu1 }
 0x1f6   :  { %v300_v53 = vpop.f32.mrb[2].mxu1 }
 0x1f7   :  { %v303_v54 = vpack.c.bf16 %v298_v51, %v298_v51  ;;  %v908_v55 = vpop.f32.mrb[3].mxu1 }
 0x1f9   :  { %926 = vmatmul.mubr.bf16.vlgmr.msra.gmra.mrb[4].mxu0 %v303_v54 }
 0x1fa   :  { %953 = vmatprep.mubr.msk.f32.mxu0 %vm1118_vm0, %v1117_v1  ;;  %972 = vmatpush3.bf16.msra.mxu0 %v971_v2 }
 0x1fb   :  { %976 = vmatprep.subr.bf16.mxu0 %v1119_v0 }
 0x2cc   :  { %v404_v4 = vpop.f32.mrb[4].mxu0 }
 0x2cd   :  { %v405_v5 = vadd.f32 %v404_v4, %v321_v3  ;;  %v927_v6 = vpop.f32.mrb[5].mxu0 }
 0x2ce   :  { %v407_v7 = vpop.f32.mrb[6].mxu0 }
 0x2cf   :  { %v410_v8 = vmul.f32 0.5, %v405_v5  ;;  %v928_v9 = vpop.f32.mrb[7].mxu0 }
 0x2d1   :  { %1034 = vtanh.f32 %v410_v8 }
 0x2db   :  { %v1035_v10 = vpop.eup %1034 }
 0x2dc   :  { %v412_v11 = vadd.f32 1.0, %v1035_v10 }
 0x2de   :  { %v413_v12 = vmul.f32 0.5, %v412_v11 }
 0x2e0   :  { %v414_v13 = vmul.f32 %v413_v12, %v298_v51 }
 0x2e2   :  { %v415_v14 = vpack.c.bf16 %v414_v13, %v414_v13 }
 0x2e4   :  { %946 = vmatmul.mubr.bf16.vlgmr.msra.gmra.mrb[4].mxu1 %v415_v14 }
 0x2e5   :  { %975 = vmatpush3.bf16.msra.mxu1 %v971_v2  ;;  %960 = vmatprep.mubr.msk.f32.mxu1 %vm1118_vm0, %v1117_v1 }
 0x3b7   :  { %v515_v18 = vpop.f32.mrb[4].mxu1 }
 0x3b8   :  { %v522_v20 = vadd.f32 %v521_v17, %v515_v18  ;;  %v947_v21 = vpop.f32.mrb[5].mxu1 }
 0x3b9   :  { %v518_v22 = vpop.f32.mrb[6].mxu1 }
 0x3ba   :  { %v523_v23 = vadd.f32 %v522_v20, %v192_v19  ;;  %v948_v24 = vpop.f32.mrb[7].mxu1 }
 0x3bc   :  { %954 = vmatmul.mubr.msk.f32.vlgmr.msra.gmra.mrb[8].mxu0 %vm526_vm1, %v523_v23 }
 0x3bd   :  { %978 = vmatpush3.bf16.msra.mxu0 %v971_v2  ;;  %967 = vmatprep.mubr.msk.f32.mxu0 %vm1118_vm0, %v1117_v1 }
 0x48f   :  { %v596_v25 = vpop.f32.mrb[8].mxu0 }
 0x490   :  { %v600_v26 = vmul.f32 0.25, %v596_v25  ;;  %v955_v27 = vpop.f32.mrb[9].mxu0 }
 0x492   :  { %v601_v28 = vsub.f32 %v523_v23, %v600_v26 }
 0x494   :  { %v602_v29 = vmul.f32 %v601_v28, %v601_v28 }
 0x496   :  { %961 = vmatmul.mubr.msk.f32.vlgmr.msra.gmra.mrb[8].mxu1 %vm526_vm1, %v602_v29 }
 0x569   :  { %v672_v30 = vpop.f32.mrb[8].mxu1 }
 0x56a   :  { %v676_v31 = vmul.f32 0.25, %v672_v30  ;;  %v962_v32 = vpop.f32.mrb[9].mxu1 }
 0x56c   :  { %v677_v33 = vadd.f32 1e-05, %v676_v31 }
 0x56e   :  { %1036 = vrsqrt.f32 %v677_v33 }
 0x578   :  { %v1037_v34 = vpop.eup %1036 }
 0x579   :  { %v679_v36 = vmul.f32 %v1037_v34, %v601_v28 }
 0x57b   :  { %v681_v38 = vmul.f32 %v680_v35, %v679_v36 }
 0x57d   :  { %v683_v39 = vadd.f32 %v682_v37, %v681_v38 }
 0x57f   :  { %v684_v40 = vmul.f32 1.442695, %v683_v39 }
 0x581   :  { %1038 = vpow2.f32 %v684_v40 }
 0x58b   :  { %v1039_v1 = vpop.eup %1038 }
 0x58c   :  { %968 = vmatmul.mubr.msk.f32.vlgmr.msra.gmra.mrb[10].mxu0 %vm526_vm1, %v1039_v1 }
 0x65f   :  { %v755_v41 = vpop.f32.mrb[10].mxu0 }
 0x660   :  { %1040 = vrcp.f32 %v755_v41  ;;  %v969_v42 = vpop.f32.mrb[11].mxu0 }
 0x66a   :  { %v1041_v43 = vpop.eup %1040 }
 0x66b   :  { %v760_v44 = vmul.f32 %v1041_v43, %v1039_v1 }
 0x66d   :  { %761 = vst.msk [vmem:[#allocation7] sm:$0xff] %vm526_vm1, %v760_v44 }
 0x66e   :  { %1097 = shalt.err (!%p1094_p6)
}
 0x66f   :  { %s1098_s20 = scalar_lea.hbm %s1369_s5, 128 }
 0x670   :  { %p1099_p7 = scmp.ne.s32.totalorder %s1369_s5, %s1098_s20  ;;  %p1102_p8 = scmp.lt.u32.totalorder %s1098_s20, %s1369_s5 }
 0x672   :  { %p1104_p9 = pnand %p1102_p8, %p1099_p7 }
 0x674   :  { %1107 = shalt.err (!%p1104_p9)
}
 0x675   :  { %771 = dma.vmem_to_hbm [thread:$0]  %s769_s3, 128, %s1369_s5, [#allocation4]  }
 0x676   :  { %1112 = dma.done.wait [#allocation4], 128  }
 0x677   :  { %1113 = vsyncadd [#allocation4], 4294967168 }
 0x678   :  { %775 = vsyncpa [#allocation3], 1 }
 0x679   :  { %776 = vsyncpa [#allocation6], 1 }
 0x67a   :  { %777 = vsyncpa [#allocation4], 1 }

</bundles_post_ra>
